<compile_context>
chip_gen: v6e
topology: v6e:2x2x1
jax: 0.10.0
libtpu: 0.0.40
codegen_flags: <defaults>
</compile_context>

<pallas_src>
import jax
import jax.numpy as jnp
from jax.experimental import pallas as pl
from jax.experimental.pallas import tpu as pltpu

N = 4                  # grid side -> one-hot size N**2 = 16
HIDDEN_WIDTH = 128
N_ACTIONS = 4
OUT_PAD = 128          # output layer padded to a full 128-lane tile (in-kernel only)


def _round_up(x, m):
    return ((x + m - 1) // m) * m


def dqn_kernel(idx_ref, t1_ref, w2_ref, b2_ref, w3_ref, b3_ref, o_ref):
    """One batch tile: one-hot encode, 3 MXU matmuls (layer-1 bias+ReLU folded
    into t1), then a narrow 4-column store to HBM."""
    bB = idx_ref.shape[0]

    # One-hot encoding of the integer states (== the `new_x[arange(B), x] = 1`
    # scatter in the PyTorch forward), built in-register.
    lanes = jax.lax.broadcasted_iota(jnp.int32, (bB, N * N), 1)
    x = (lanes == idx_ref[...]).astype(t1_ref.dtype)                  # (bB, 16)

    # hidden1: bias + ReLU are already folded into t1; f32 accumulation on MXU.
    h = jnp.dot(x, t1_ref[...], preferred_element_type=jnp.float32)   # (bB, 128)

    # hidden2 + ReLU (weights may be bf16; accumulate in f32).
    h = jnp.dot(h.astype(w2_ref.dtype), w2_ref[...],
                preferred_element_type=jnp.float32) + b2_ref[...]
    h = jnp.maximum(h, 0.0)

    # output layer: matmul against a 128-lane-padded weight (lane-dense MXU
    # work), but only the 4 real action columns are written back to HBM.
    out = jnp.dot(h.astype(w3_ref.dtype), w3_ref[...],
                  preferred_element_type=jnp.float32) + b3_ref[...]   # (bB, 128)
    o_ref[...] = out[:, :N_ACTIONS].astype(o_ref.dtype)


def dqn_forward(idx, params, *, block_b=1024, matmul_dtype=jnp.float32):
    """idx: (B,) int32 state indices in [0, N**2). Returns (B, 4) float32 Q-values.

    block_b:      max batch rows per grid step (1024 amortizes the per-step
                  overhead on all generations; any multiple of 8 works).
    matmul_dtype: dtype of all three weight matrices fed to the MXU (bfloat16
                  cuts MXU passes on every generation, v5e included);
                  accumulation stays float32.

    Note: out-of-range indices (<0 or >=16) produce an all-zero one-hot row, so
    they yield Q-values from a zero hidden state instead of faulting like
    PyTorch's scatter would.
    """
    w1, b1, w2, b2, w3, b3 = params
    B = idx.shape[0]

    # Layer-1 bias + ReLU folded into the weights (exact for one-hot rows):
    #   onehot(i) @ relu(w1 + b1) == relu(onehot(i) @ w1 + b1).
    t1 = jnp.maximum(w1 + b1, 0.0).astype(matmul_dtype)               # (16, 128)
    w2c = w2.astype(matmul_dtype)                                     # (128, 128)

    # Output layer padded to a full 128-lane tile for the in-kernel MXU matmul;
    # only the 4 real action columns are written to HBM (see out_specs below).
    w3p = jnp.zeros((HIDDEN_WIDTH, OUT_PAD), jnp.float32).at[:, :N_ACTIONS].set(w3)
    w3c = w3p.astype(matmul_dtype)
    b3p = jnp.zeros((1, OUT_PAD), jnp.float32).at[:, :N_ACTIONS].set(b3)

    # Batch tiling: tile must be a multiple of 8 sublanes.  Clamp the tile to
    # ~ceil(B/2) when B would otherwise fit in one tile, so there are >=2 grid
    # steps and v7x's two TensorCores both get work ("parallel" axis below).
    block_b = max(8, _round_up(block_b, 8))
    half = _round_up((B + 1) // 2, 8)
    bB = min(block_b, max(half, 8))
    Bp = _round_up(B, bB)
    n_blocks = Bp // bB

    idx2d = jnp.zeros((Bp, 1), jnp.int32).at[:B, 0].set(idx.astype(jnp.int32))

    # Constant index_maps -> weights stay resident in VMEM across grid steps.
    resident = lambda arr: pl.BlockSpec(arr.shape, lambda i: (0, 0))

    out = pl.pallas_call(
        dqn_kernel,
        out_shape=jax.ShapeDtypeStruct((Bp, N_ACTIONS), jnp.float32),
        grid=(n_blocks,),
        in_specs=[
            pl.BlockSpec((bB, 1), lambda i: (i, 0)),   # per-tile state indices
            resident(t1), resident(w2c), resident(b2),
            resident(w3c), resident(b3p),
        ],
        out_specs=pl.BlockSpec((bB, N_ACTIONS), lambda i: (i, 0)),
        compiler_params=pltpu.CompilerParams(
            dimension_semantics=("parallel",),          # shard tiles over v7x's 2 TCs
        ),
    )(idx2d, t1, w2c, b2, w3c, b3p)

    return out[:B]


def init_params(key):
    """Deterministic init mirroring the PyTorch layer shapes.
    PyTorch Linear stores weight as (out, in); here we keep (in, out)."""
    k1, k2, k3, k4, k5, k6 = jax.random.split(key, 6)

    def uinit(k, shape, fan_in):
        bound = 1.0 / jnp.sqrt(fan_in)
        return jax.random.uniform(k, shape, jnp.float32, -bound, bound)

    w1 = uinit(k1, (N * N, HIDDEN_WIDTH), N * N)
    b1 = uinit(k2, (1, HIDDEN_WIDTH), N * N)
    w2 = uinit(k3, (HIDDEN_WIDTH, HIDDEN_WIDTH), HIDDEN_WIDTH)
    b2 = uinit(k4, (1, HIDDEN_WIDTH), HIDDEN_WIDTH)
    w3 = uinit(k5, (HIDDEN_WIDTH, N_ACTIONS), HIDDEN_WIDTH)
    b3 = uinit(k6, (1, N_ACTIONS), HIDDEN_WIDTH)
    return (w1, b1, w2, b2, w3, b3)


def dqn_reference(idx, params):
    """Plain-JAX reference of the same forward pass (f32)."""
    w1, b1, w2, b2, w3, b3 = params
    x = jax.nn.one_hot(idx, N * N, dtype=jnp.float32)
    h = jnp.maximum(x @ w1 + b1, 0.0)
    h = jnp.maximum(h @ w2 + b2, 0.0)
    return h @ w3 + b3


def dqn_reference_lowp(idx, params, dtype):
    """Plain-JAX reference matching the low-precision-weight kernel path
    (weights cast to `dtype`, layer-1 bias+ReLU folded, f32 accumulation)."""
    w1, b1, w2, b2, w3, b3 = params
    t1 = jnp.maximum(w1 + b1, 0.0).astype(dtype)
    h = t1[idx].astype(jnp.float32)            # == onehot(dtype) @ t1, f32 acc
    h = jnp.dot(h.astype(dtype), w2.astype(dtype),
                preferred_element_type=jnp.float32) + b2
    h = jnp.maximum(h, 0.0)
    return jnp.dot(h.astype(dtype), w3.astype(dtype),
                   preferred_element_type=jnp.float32) + b3


if __name__ == "__main__":
    key = jax.random.PRNGKey(0)
    pkey, xkey, x2key = jax.random.split(key, 3)
    params = init_params(pkey)

    # --- small batch (single grid step), f32 ---
    B = 8
    x = jax.random.randint(xkey, (B,), 0, N * N, dtype=jnp.int32)
    out = jax.block_until_ready(dqn_forward(x, params))
    ref = dqn_reference(x, params)
    assert out.shape == (B, N_ACTIONS)
    assert jnp.allclose(out, ref, atol=1e-5, rtol=1e-5), \
        float(jnp.max(jnp.abs(out - ref)))

    # --- multi-tile batch with padding (2 grid steps of 152 rows), f32 ---
    B2 = 300
    x2 = jax.random.randint(x2key, (B2,), 0, N * N, dtype=jnp.int32)
    out2 = jax.block_until_ready(dqn_forward(x2, params))
    ref2 = dqn_reference(x2, params)
    assert out2.shape == (B2, N_ACTIONS)
    assert jnp.allclose(out2, ref2, atol=1e-5, rtol=1e-5), \
        float(jnp.max(jnp.abs(out2 - ref2)))

    # --- bf16 weights on all layers, f32 accumulation ---
    out3 = jax.block_until_ready(dqn_forward(x2, params, matmul_dtype=jnp.bfloat16))
    ref3 = dqn_reference_lowp(x2, params, jnp.bfloat16)
    assert jnp.allclose(out3, ref3, atol=1e-3, rtol=1e-3), \
        float(jnp.max(jnp.abs(out3 - ref3)))

    print("KERNEL_OK")
</pallas_src>

<mosaic_0001>
module attributes {stable_mosaic.version = 11 : i64} {
  func.func @dqn_kernel(%arg0: i32, %arg1: memref<8x1xi32, #tpu.memory_space<vmem>>, %arg2: memref<16x128xf32, #tpu.memory_space<vmem>>, %arg3: memref<128x128xf32, #tpu.memory_space<vmem>>, %arg4: memref<1x128xf32, #tpu.memory_space<vmem>>, %arg5: memref<128x128xf32, #tpu.memory_space<vmem>>, %arg6: memref<1x128xf32, #tpu.memory_space<vmem>>, %arg7: memref<8x4xf32, #tpu.memory_space<vmem>>) attributes {dimension_semantics = [#tpu.dimension_semantics<parallel>], iteration_bounds = array<i64: 1>, scalar_prefetch = 0 : i64, scratch_operands = 0 : i64, tpu.core_type = #tpu.core_type<tc>, window_params = [{transform_indices = @transform_0, window_bounds = array<i64: 8, 1>}, {pipeline_mode = #tpu.pipeline_mode<synchronous>, transform_indices = @transform_1, window_bounds = array<i64: 16, 128>}, {pipeline_mode = #tpu.pipeline_mode<synchronous>, transform_indices = @transform_2, window_bounds = array<i64: 128, 128>}, {pipeline_mode = #tpu.pipeline_mode<synchronous>, transform_indices = @transform_3, window_bounds = array<i64: 1, 128>}, {pipeline_mode = #tpu.pipeline_mode<synchronous>, transform_indices = @transform_4, window_bounds = array<i64: 128, 128>}, {pipeline_mode = #tpu.pipeline_mode<synchronous>, transform_indices = @transform_5, window_bounds = array<i64: 1, 128>}, {transform_indices = @transform_6, window_bounds = array<i64: 8, 4>}]} {
    %0 = tpu.iota {dimensions = array<i32: 1>} : vector<8x16xi32>
    %c0 = arith.constant 0 : index
    %c0_0 = arith.constant 0 : index
    %1 = vector.load %arg1[%c0, %c0_0] : memref<8x1xi32, #tpu.memory_space<vmem>>, vector<8x1xi32>
    %2 = vector.broadcast %1 : vector<8x1xi32> to vector<8x16xi32>
    %3 = arith.cmpi eq, %0, %2 : vector<8x16xi32>
    %4 = arith.extui %3 : vector<8x16xi1> to vector<8x16xi32>
    %5 = arith.sitofp %4 : vector<8x16xi32> to vector<8x16xf32>
    %c0_1 = arith.constant 0 : index
    %c0_2 = arith.constant 0 : index
    %6 = vector.load %arg2[%c0_1, %c0_2] : memref<16x128xf32, #tpu.memory_space<vmem>>, vector<16x128xf32>
    %cst = arith.constant dense<0.000000e+00> : vector<8x128xf32>
    %7 = tpu.matmul %5, %6, %cst {dimension_numbers = #tpu.dot_dimension_numbers<[1], [0], [0], [1], [0, 0, 1, 1], [], []>} : vector<8x16xf32>, vector<16x128xf32>, vector<8x128xf32> -> vector<8x128xf32>
    %c0_3 = arith.constant 0 : index
    %c0_4 = arith.constant 0 : index
    %8 = vector.load %arg3[%c0_3, %c0_4] : memref<128x128xf32, #tpu.memory_space<vmem>>, vector<128x128xf32>
    %cst_5 = arith.constant dense<0.000000e+00> : vector<8x128xf32>
    %9 = tpu.matmul %7, %8, %cst_5 {dimension_numbers = #tpu.dot_dimension_numbers<[1], [0], [0], [1], [0, 0, 1, 1], [], []>} : vector<8x128xf32>, vector<128x128xf32>, vector<8x128xf32> -> vector<8x128xf32>
    %c0_6 = arith.constant 0 : index
    %c0_7 = arith.constant 0 : index
    %10 = vector.load %arg4[%c0_6, %c0_7] : memref<1x128xf32, #tpu.memory_space<vmem>>, vector<1x128xf32>
    %11 = vector.broadcast %10 : vector<1x128xf32> to vector<8x128xf32>
    %12 = arith.addf %9, %11 : vector<8x128xf32>
    %cst_8 = arith.constant 0.000000e+00 : f32
    %13 = vector.broadcast %cst_8 : f32 to vector<8x128xf32>
    %14 = arith.maximumf %12, %13 : vector<8x128xf32>
    %c0_9 = arith.constant 0 : index
    %c0_10 = arith.constant 0 : index
    %15 = vector.load %arg5[%c0_9, %c0_10] : memref<128x128xf32, #tpu.memory_space<vmem>>, vector<128x128xf32>
    %cst_11 = arith.constant dense<0.000000e+00> : vector<8x128xf32>
    %16 = tpu.matmul %14, %15, %cst_11 {dimension_numbers = #tpu.dot_dimension_numbers<[1], [0], [0], [1], [0, 0, 1, 1], [], []>} : vector<8x128xf32>, vector<128x128xf32>, vector<8x128xf32> -> vector<8x128xf32>
    %c0_12 = arith.constant 0 : index
    %c0_13 = arith.constant 0 : index
    %17 = vector.load %arg6[%c0_12, %c0_13] : memref<1x128xf32, #tpu.memory_space<vmem>>, vector<1x128xf32>
    %18 = vector.broadcast %17 : vector<1x128xf32> to vector<8x128xf32>
    %19 = arith.addf %16, %18 : vector<8x128xf32>
    %20 = vector.extract_strided_slice %19 {offsets = [0, 0], sizes = [8, 4], strides = [1, 1]} : vector<8x128xf32> to vector<8x4xf32>
    %c0_14 = arith.constant 0 : index
    %c0_15 = arith.constant 0 : index
    %21 = vector.load %arg7[%c0_14, %c0_15] : memref<8x4xf32, #tpu.memory_space<vmem>>, vector<8x4xf32>
    tpu.vector_store %arg7[%c0_14, %c0_15], %20 {strides = array<i32>} : memref<8x4xf32, #tpu.memory_space<vmem>>, vector<8x4xf32>,
    return
  }
  func.func @transform_0(%arg0: i32) -> (i32, i32) {
    %c0_i32 = arith.constant 0 : i32
    %c0_i32_0 = arith.constant 0 : i32
    return %arg0, %c0_i32 : i32, i32
  }
  func.func @transform_1(%arg0: i32) -> (i32, i32) {
    %c0_i32 = arith.constant 0 : i32
    %c0_i32_0 = arith.constant 0 : i32
    %c0_i32_1 = arith.constant 0 : i32
    return %c0_i32, %c0_i32_0 : i32, i32
  }
  func.func @transform_2(%arg0: i32) -> (i32, i32) {
    %c0_i32 = arith.constant 0 : i32
    %c0_i32_0 = arith.constant 0 : i32
    %c0_i32_1 = arith.constant 0 : i32
    return %c0_i32, %c0_i32_0 : i32, i32
  }
  func.func @transform_3(%arg0: i32) -> (i32, i32) {
    %c0_i32 = arith.constant 0 : i32
    %c0_i32_0 = arith.constant 0 : i32
    %c0_i32_1 = arith.constant 0 : i32
    return %c0_i32, %c0_i32_0 : i32, i32
  }
  func.func @transform_4(%arg0: i32) -> (i32, i32) {
    %c0_i32 = arith.constant 0 : i32
    %c0_i32_0 = arith.constant 0 : i32
    %c0_i32_1 = arith.constant 0 : i32
    return %c0_i32, %c0_i32_0 : i32, i32
  }
  func.func @transform_5(%arg0: i32) -> (i32, i32) {
    %c0_i32 = arith.constant 0 : i32
    %c0_i32_0 = arith.constant 0 : i32
    %c0_i32_1 = arith.constant 0 : i32
    return %c0_i32, %c0_i32_0 : i32, i32
  }
  func.func @transform_6(%arg0: i32) -> (i32, i32) {
    %c0_i32 = arith.constant 0 : i32
    %c0_i32_0 = arith.constant 0 : i32
    return %arg0, %c0_i32 : i32, i32
  }
}

</mosaic_0001>

<bundles_post_ra>
// kernel: tpu_custom_call.1
= control target key start
LH: loop header
LB: loop body
LE: loop exit
PB: predicated region body
PF: predicated region fallthrough
CT: control target
= control target key end

     0   :  { %11 = vsyncpa [#allocation3], 0  ;;  %s640_s0 = inlined_call_operand.vmem [shape: s32[8,1], index: 0, kind: input, shape index: {}]   ;;  %s641_s1 = inlined_call_operand.hbm [shape: f32[16,128], index: 1, kind: input, shape index: {}]   ;;  %s642_s2 = inlined_call_operand.hbm [shape: f32[128,128], index: 2, kind: input, shape index: {}]   ;;  %s643_s3 = inlined_call_operand.vmem [shape: f32[1,128], index: 3, kind: input, shape index: {}]   ;;  %s644_s4 = inlined_call_operand.hbm [shape: f32[128,128], index: 4, kind: input, shape index: {}]   ;;  %s645_s5 = inlined_call_operand.vmem [shape: f32[1,128], index: 5, kind: input, shape index: {}]   ;;  %s646_s6 = inlined_call_operand.vmem [shape: f32[8,4], index: 6, kind: output, shape index: {}]  }
   0x1   :  { %12 = vsyncpa [#allocation5], 0  ;;  %s535_s21 = smov [#allocation4]   ;;  %s536_s23 = smov [#allocation2]  }
   0x2   :  { %s32_s22 = sshll.u32 %s535_s21, 4  ;;  %s20_s24 = sshll.u32 %s536_s23, 4  ;;  %s33_s22 = int_to_ptr.vmem [resolvable:$true] %s32_s22  ;;  %s21_s24 = int_to_ptr.vmem [resolvable:$true] %s20_s24 }
   0x3   :  { %s479_s25 = scalar_lea.vmem %s33_s22, 2048  ;;  %p484_p1 = scmp.lt.s32.totalorder %s33_s22, %s33_s22 }
   0x4   :  { %p480_p0 = scmp.ne.s32.totalorder %s33_s22, %s479_s25  ;;  %p485_p2 = scmp.lt.s32.totalorder %s479_s25, %s479_s25 }
   0x6   :  { %p486_p3 = por %p485_p2, %p484_p1 }
   0x8   :  { %p487_p4 = pnand %p486_p3, %p480_p0 }
   0xa   :  { %490 = shalt.err (!%p487_p4)
}
   0xb   :  { %s537_s26 = smov 128   ;;  %s538_s27 = smov 8  }
   0xc   :  { %38 = dma.hbm_to_vmem [thread:$0]  %s642_s2, 2048, %s33_s22, [#allocation5], %s537_s26, %s537_s26, %s538_s27  }
   0xd   :  { %s499_s30 = scalar_lea.vmem %s21_s24, 256  ;;  %p504_p6 = scmp.lt.s32.totalorder %s21_s24, %s21_s24 }
   0xe   :  { %p500_p5 = scmp.ne.s32.totalorder %s21_s24, %s499_s30  ;;  %p505_p7 = scmp.lt.s32.totalorder %s499_s30, %s499_s30 }
  0x10   :  { %p506_p8 = por %p505_p7, %p504_p6 }
  0x12   :  { %p507_p9 = pnand %p506_p8, %p500_p5 }
  0x14   :  { %510 = shalt.err (!%p507_p9)
}
  0x15   :  { %26 = dma.hbm_to_vmem [thread:$0]  %s641_s1, 256, %s21_s24, [#allocation3], %s537_s26, %s537_s26, %s538_s27  }
  0x16   :  { %s539_s9 = smov [#allocation6]  }
  0x17   :  { %s46_s10 = sshll.u32 %s539_s9, 4  ;;  %s47_s10 = int_to_ptr.vmem [resolvable:$true] %s46_s10 }
  0x18   :  { %s519_s11 = scalar_lea.vmem %s47_s10, 2048  ;;  %p524_p11 = scmp.lt.s32.totalorder %s47_s10, %s47_s10 }
  0x19   :  { %p520_p10 = scmp.ne.s32.totalorder %s47_s10, %s519_s11  ;;  %p525_p12 = scmp.lt.s32.totalorder %s519_s11, %s519_s11 }
  0x1b   :  { %p526_p13 = por %p525_p12, %p524_p11 }
  0x1d   :  { %p527_p0 = pnand %p526_p13, %p520_p10 }
  0x1f   :  { %530 = shalt.err (!%p527_p0)
}
  0x20   :  { %52 = dma.hbm_to_vmem [thread:$0]  %s644_s4, 2048, %s47_s10, [#allocation5], %s537_s26, %s537_s26, %s538_s27  }
  0x21   :  { %531 = dma.done.wait [#allocation3], 256  }
  0x22   :  { %532 = vsyncadd [#allocation3], 4294967040 }
  0x23   :  { %533 = dma.done.wait [#allocation5], 4096  }
  0x24   :  { %534 = vsyncadd [#allocation5], 4294963200  ;;  %v540_v0 = vmov 0   ;;  %v541_v1 = vmov 0.0   ;;  %vm542_vm0 = vmmov 0   ;;  %v66_v2 = vld [vmem:[%s640_s0] sm:$0xff]  ;;  %v64_v20 = vlaneseq }
  0x25   :  { %470 = vset.pattern.permute.xlu0 %v540_v0  ;;  %385 = vmatprep.subr.mxu0 %v541_v1  ;;  %v74_v3 = vld [vmem:[#allocation2 + $0x8] sm:$0xff]  ;;  %v73_v4 = vld [vmem:[#allocation2] sm:$0xff]  ;;  %v162_v7 = vld [vmem:[#allocation4 + $0x68] sm:$0xff]  ;;  %vm75_vm1 = vcmask 130048   ;;  %vm336_vm3 = vcmask 31744  }
  0x26   :  { %392 = vmatprep.subr.mxu1 %v541_v1  ;;  %389 = vmatprep.mubr.msk.f32.mxu0 %vm542_vm0, %v541_v1  ;;  %v164_v5 = vld [vmem:[#allocation4 + $0x78] sm:$0xff]  ;;  %v163_v6 = vld [vmem:[#allocation4 + $0x70] sm:$0xff]  ;;  %v161_v8 = vld [vmem:[#allocation4 + $0x60] sm:$0xff]  ;;  %v65_v21 = vand.u32 127, %v64_v20 }
  0x27   :  { %424 = vmatprep.mubr.msk.f32.mxu1 %vm542_vm0, %v541_v1  ;;  %68 = vperm.xlu0 %470, %v66_v2   ;;  %v160_v9 = vld [vmem:[#allocation4 + $0x58] sm:$0xff]  ;;  %v159_v10 = vld [vmem:[#allocation4 + $0x50] sm:$0xff]  ;;  %v158_v11 = vld [vmem:[#allocation4 + $0x48] sm:$0xff] }
  0x28   :  { %386 = vmatpush3.msra.mxu0 %v74_v3  ;;  %393 = vmatpush3.msra.mxu1 %v164_v5  ;;  %v157_v12 = vld [vmem:[#allocation4 + $0x40] sm:$0xff]  ;;  %v156_v13 = vld [vmem:[#allocation4 + $0x38] sm:$0xff]  ;;  %v155_v14 = vld [vmem:[#allocation4 + $0x30] sm:$0xff] }
  0x29   :  { %387 = vmatprep.subr.mxu0 %v541_v1  ;;  %394 = vmatprep.subr.mxu1 %v541_v1  ;;  %v154_v15 = vld [vmem:[#allocation4 + $0x28] sm:$0xff]  ;;  %v153_v16 = vld [vmem:[#allocation4 + $0x20] sm:$0xff]  ;;  %v152_v17 = vld [vmem:[#allocation4 + $0x18] sm:$0xff] }
  0x2a   :  { %388 = vmatpush3.msra.mxu0 %v73_v4  ;;  %395 = vmatpush3.msra.mxu1 %v163_v6  ;;  %v151_v18 = vld [vmem:[#allocation4 + $0x10] sm:$0xff]  ;;  %v150_v19 = vld [vmem:[#allocation4 + $0x8] sm:$0xff]  ;;  %v149_v24 = vld [vmem:[#allocation4] sm:$0xff] }
  0x2b   :  { %427 = vmatprep.subr.mxu0 %v541_v1  ;;  %396 = vmatprep.subr.mxu1 %v541_v1  ;;  %v258_v25 = vld [vmem:[#allocation6 + $0x78] sm:$0xff]  ;;  %v257_v26 = vld [vmem:[#allocation6 + $0x70] sm:$0xff]  ;;  %v256_v27 = vld [vmem:[#allocation6 + $0x68] sm:$0xff] }
  0x2c   :  { %397 = vmatpush3.msra.mxu1 %v162_v7  ;;  %v255_v28 = vld [vmem:[#allocation6 + $0x60] sm:$0xff]  ;;  %v254_v29 = vld [vmem:[#allocation6 + $0x58] sm:$0xff]  ;;  %v253_v30 = vld [vmem:[#allocation6 + $0x50] sm:$0xff] }
  0x2d   :  { %398 = vmatprep.subr.mxu1 %v541_v1  ;;  %v252_v31 = vld [vmem:[#allocation6 + $0x48] sm:$0xff]  ;;  %v251_v32 = vld [vmem:[#allocation6 + $0x40] sm:$0xff]  ;;  %v250_v33 = vld [vmem:[#allocation6 + $0x38] sm:$0xff] }
  0x2e   :  { %399 = vmatpush3.msra.mxu1 %v161_v8  ;;  %v249_v34 = vld [vmem:[#allocation6 + $0x30] sm:$0xff]  ;;  %v248_v35 = vld [vmem:[#allocation6 + $0x28] sm:$0xff]  ;;  %v247_v36 = vld [vmem:[#allocation6 + $0x20] sm:$0xff] }
  0x2f   :  { %400 = vmatprep.subr.mxu1 %v541_v1  ;;  %v246_v37 = vld [vmem:[#allocation6 + $0x18] sm:$0xff]  ;;  %v245_v40 = vld [vmem:[#allocation6 + $0x10] sm:$0xff]  ;;  %v244_v41 = vld [vmem:[#allocation6 + $0x8] sm:$0xff] }
  0x30   :  { %401 = vmatpush3.msra.mxu1 %v160_v9  ;;  %v243_v42 = vld [vmem:[#allocation6] sm:$0xff]  ;;  %v346_v43 = vld [vmem:[%s643_s3] ss:$0 sm:$0xff] }
  0x31   :  { %402 = vmatprep.subr.mxu1 %v541_v1  ;;  %v347_v48 = vld [vmem:[%s645_s5] ss:$0 sm:$0xff] }
  0x32   :  { %403 = vmatpush3.msra.mxu1 %v159_v10 }
  0x33   :  { %404 = vmatprep.subr.mxu1 %v541_v1 }
  0x34   :  { %405 = vmatpush3.msra.mxu1 %v158_v11 }
  0x35   :  { %406 = vmatprep.subr.mxu1 %v541_v1 }
  0x36   :  { %407 = vmatpush3.msra.mxu1 %v157_v12 }
  0x37   :  { %408 = vmatprep.subr.mxu1 %v541_v1 }
  0x38   :  { %409 = vmatpush3.msra.mxu1 %v156_v13 }
  0x39   :  { %410 = vmatprep.subr.mxu1 %v541_v1 }
  0x3a   :  { %411 = vmatpush3.msra.mxu1 %v155_v14 }
  0x3b   :  { %412 = vmatprep.subr.mxu1 %v541_v1 }
  0x3c   :  { %413 = vmatpush3.msra.mxu1 %v154_v15 }
  0x3d   :  { %414 = vmatprep.subr.mxu1 %v541_v1 }
  0x3e   :  { %415 = vmatpush3.msra.mxu1 %v153_v16 }
  0x3f   :  { %416 = vmatprep.subr.mxu1 %v541_v1 }
  0x40   :  { %417 = vmatpush3.msra.mxu1 %v152_v17 }
  0x41   :  { %418 = vmatprep.subr.mxu1 %v541_v1 }
  0x42   :  { %419 = vmatpush3.msra.mxu1 %v151_v18 }
  0x43   :  { %420 = vmatprep.subr.mxu1 %v541_v1 }
  0x44   :  { %421 = vmatpush3.msra.mxu1 %v150_v19 }
  0x45   :  { %422 = vmatprep.subr.mxu1 %v541_v1 }
  0x46   :  { %423 = vmatpush3.msra.mxu1 %v149_v24 }
  0xa2   :  { %v69_v22 = vpop.permute.xlu0 %68 }
  0xa3   :  { %vm70_vm2 = vcmp.eq.s32.totalorder %v65_v21, %v69_v22 }
  0xa4   :  { %v344_v23 = vsel %vm70_vm2, 1.0, %v541_v1 }
  0xa5   :  { %390 = vmatmul.mubr.msk.f32.vlgmr.msra.gmra.mxu0 %vm75_vm1, %v344_v23 }
  0xa6   :  { %459 = vmatprep.mubr.msk.f32.mxu0 %vm542_vm0, %v541_v1  ;;  %428 = vmatpush3.msra.mxu0 %v258_v25 }
  0xa7   :  { %429 = vmatprep.subr.mxu0 %v541_v1 }
  0xa8   :  { %430 = vmatpush3.msra.mxu0 %v257_v26 }
  0xa9   :  { %431 = vmatprep.subr.mxu0 %v541_v1 }
  0xaa   :  { %432 = vmatpush3.msra.mxu0 %v256_v27 }
  0xab   :  { %433 = vmatprep.subr.mxu0 %v541_v1 }
  0xac   :  { %434 = vmatpush3.msra.mxu0 %v255_v28 }
  0xad   :  { %435 = vmatprep.subr.mxu0 %v541_v1 }
  0xae   :  { %436 = vmatpush3.msra.mxu0 %v254_v29 }
  0xaf   :  { %437 = vmatprep.subr.mxu0 %v541_v1 }
  0xb0   :  { %438 = vmatpush3.msra.mxu0 %v253_v30 }
  0xb1   :  { %439 = vmatprep.subr.mxu0 %v541_v1 }
  0xb2   :  { %440 = vmatpush3.msra.mxu0 %v252_v31 }
  0xb3   :  { %441 = vmatprep.subr.mxu0 %v541_v1 }
  0xb4   :  { %442 = vmatpush3.msra.mxu0 %v251_v32 }
  0xb5   :  { %443 = vmatprep.subr.mxu0 %v541_v1 }
  0xb6   :  { %444 = vmatpush3.msra.mxu0 %v250_v33 }
  0xb7   :  { %445 = vmatprep.subr.mxu0 %v541_v1 }
  0xb8   :  { %446 = vmatpush3.msra.mxu0 %v249_v34 }
  0xb9   :  { %447 = vmatprep.subr.mxu0 %v541_v1 }
  0xba   :  { %448 = vmatpush3.msra.mxu0 %v248_v35 }
  0xbb   :  { %449 = vmatprep.subr.mxu0 %v541_v1 }
  0xbc   :  { %450 = vmatpush3.msra.mxu0 %v247_v36 }
  0xbd   :  { %451 = vmatprep.subr.mxu0 %v541_v1 }
  0xbe   :  { %452 = vmatpush3.msra.mxu0 %v246_v37 }
  0xbf   :  { %453 = vmatprep.subr.mxu0 %v541_v1 }
  0xc0   :  { %454 = vmatpush3.msra.mxu0 %v245_v40 }
  0xc1   :  { %455 = vmatprep.subr.mxu0 %v541_v1 }
  0xc2   :  { %456 = vmatpush3.msra.mxu0 %v244_v41 }
  0xc3   :  { %457 = vmatprep.subr.mxu0 %v541_v1 }
  0xc4   :  { %458 = vmatpush3.msra.mxu0 %v243_v42 }
 0x165   :  { %v145_v38 = vpop.f32.mrf.mxu0 }
 0x166   :  { %425 = vmatmul.mubr.f32.vlgmr.msra.gmra.mxu1 %v145_v38 }
 0x167   :  { %v391_v39 = vpop.f32.mrf.mxu0 }
 0x226   :  { %v238_v44 = vpop.f32.mrf.mxu1 }
 0x227   :  { %v239_v45 = vadd.f32 %v346_v43, %v238_v44 }
 0x228   :  { %v426_v46 = vpop.f32.mrf.mxu1 }
 0x229   :  { %v242_v47 = vmax.f32 %v239_v45, 0.0 }
 0x22b   :  { %460 = vmatmul.mubr.f32.vlgmr.msra.gmra.mxu0 %v242_v47 }
 0x2eb   :  { %v332_v49 = vpop.f32.mrf.mxu0 }
 0x2ec   :  { %v333_v50 = vadd.f32 %v347_v48, %v332_v49 }
 0x2ed   :  { %v461_v51 = vpop.f32.mrf.mxu0 }
 0x2ee   :  { %337 = vst.msk [vmem:[%s646_s6] sm:$0xff] %vm336_vm3, %v333_v50 }
 0x2ef   :  { %342 = vsyncpa [#allocation3], 1 }
 0x2f0   :  { %343 = vsyncpa [#allocation5], 1 }

</bundles_post_ra>
